<compile_context>
chip_gen: v7x
topology: tpu7x:2x2x1
jax: 0.10.0
libtpu: 0.0.40
codegen_flags: <defaults>
</compile_context>

<pallas_src>
import functools
import math

import jax
import jax.numpy as jnp
from jax.experimental import pallas as pl
from jax.experimental.pallas import tpu as pltpu


# --------------------------------------------------------------------------- #
# Sinusoidal table (host-side, mirrors PyTorch __init__)
# --------------------------------------------------------------------------- #
def _build_pos_embedding(seq_len: int, embed_dim: int) -> jnp.ndarray:
    """pe[pos, 2i] = sin(pos/10000^(2i/E)), pe[pos, 2i+1] = cos(...). Shape (S, 1, E)."""
    position = jnp.arange(seq_len, dtype=jnp.float32)[:, None]              # (S, 1)
    div_term = jnp.exp(jnp.arange(0, embed_dim, 2, dtype=jnp.float32)
                       * (-math.log(10000.0) / embed_dim))                  # (E//2,)
    angles = position * div_term                                            # (S, E//2)
    pe = jnp.stack([jnp.sin(angles), jnp.cos(angles)], axis=-1)             # (S, E//2, 2)
    pe = pe.reshape(seq_len, embed_dim)                                     # interleaved
    return pe[:, None, :]                                                   # (S, 1, E)


# --------------------------------------------------------------------------- #
# Kernels
# --------------------------------------------------------------------------- #
def _pe_add_kernel(x_ref, pe_ref, o_ref):
    # x: (TILE_S, B, E), pe: (TILE_S, 1, E) -> broadcast over batch (sublanes).
    y = x_ref[...].astype(jnp.float32) + pe_ref[...]
    o_ref[...] = y.astype(o_ref.dtype)


def _pe_add_dropout_kernel(x_ref, pe_ref, bits_ref, o_ref, *, dropout_p: float):
    y = x_ref[...].astype(jnp.float32) + pe_ref[...]
    # Integer-domain dropout: drop iff bits < p * 2^32 (no int->float convert).
    thresh = jnp.uint32(min(int(round(dropout_p * 4294967296.0)), 4294967295))
    keep = bits_ref[...] >= thresh
    scale = 1.0 / (1.0 - dropout_p)
    o_ref[...] = jnp.where(keep, y * scale, 0.0).astype(o_ref.dtype)


# --------------------------------------------------------------------------- #
# Wrapper
# --------------------------------------------------------------------------- #
def _choose_tile_s(S: int, B: int, E: int, itemsize: int) -> int:
    """Pick a sequence-tile so one x tile is ~2 MiB (fits v5e/v6e/v7x VMEM with
    double-buffered in/out/bits buffers)."""
    target_bytes = 2 << 20
    rows = max(1, target_bytes // max(B * E * itemsize, 1))
    rows = min(S, rows)
    if rows < S and rows >= 8:
        rows = (rows // 8) * 8  # friendly multiple of 8 for sublane-major DMAs
    return rows


def positional_encoding_forward(token_embedding, *, dropout_p: float = 0.1,
                                max_len: int = 5000, training: bool = True,
                                rng_key=None):
    """token_embedding: [seq_len, batch, embed_dim] -> same shape/dtype."""
    S, B, E = token_embedding.shape
    if E % 2 != 0:
        raise ValueError(f"Cannot use sin/cos positional encoding with odd dim (got dim ={E})")
    if S > max_len:
        raise ValueError(f"seq_len {S} exceeds max_len {max_len}")

    pe = _build_pos_embedding(S, E)                                   # (S, 1, E) f32
    tile_s = _choose_tile_s(S, B, E, token_embedding.dtype.itemsize)
    grid = (pl.cdiv(S, tile_s),)

    x_spec = pl.BlockSpec((tile_s, B, E), lambda i: (i, 0, 0))
    pe_spec = pl.BlockSpec((tile_s, 1, E), lambda i: (i, 0, 0))
    out_spec = pl.BlockSpec((tile_s, B, E), lambda i: (i, 0, 0))
    out_shape = jax.ShapeDtypeStruct((S, B, E), token_embedding.dtype)
    cparams = pltpu.CompilerParams(dimension_semantics=("parallel",))

    p = float(dropout_p) if training else 0.0
    if p <= 0.0:
        return pl.pallas_call(
            _pe_add_kernel,
            out_shape=out_shape,
            grid=grid,
            in_specs=[x_spec, pe_spec],
            out_specs=out_spec,
            compiler_params=cparams,
        )(token_embedding, pe)

    if rng_key is None:
        rng_key = jax.random.PRNGKey(0)
    bits = jax.random.bits(rng_key, (S, B, E), dtype=jnp.uint32)

    kernel = functools.partial(_pe_add_dropout_kernel, dropout_p=p)
    return pl.pallas_call(
        kernel,
        out_shape=out_shape,
        grid=grid,
        in_specs=[x_spec, pe_spec, x_spec],   # bits tiled exactly like x
        out_specs=out_spec,
        compiler_params=cparams,
    )(token_embedding, pe, bits)


# --------------------------------------------------------------------------- #
# Self-test
# --------------------------------------------------------------------------- #
if __name__ == "__main__":
    key = jax.random.PRNGKey(0)
    seq_len, batch, embed = 8, 2, 32
    x = jax.random.normal(key, (seq_len, batch, embed), dtype=jnp.float32)

    # Eval-mode (dropout off) — must match the pure-JAX reference exactly.
    y_eval = jax.block_until_ready(
        positional_encoding_forward(x, dropout_p=0.1, training=False))
    ref = x + _build_pos_embedding(seq_len, embed)
    assert y_eval.shape == x.shape
    assert jnp.allclose(y_eval, ref, atol=1e-5, rtol=1e-5), "mismatch vs reference"

    # Train-mode (dropout on): every output element is either 0 (dropped) or
    # (x + pe) / (1 - p) (kept, inverted scaling).
    drop_p = 0.1
    y_train = jax.block_until_ready(
        positional_encoding_forward(x, dropout_p=drop_p, training=True,
                                    rng_key=jax.random.PRNGKey(1234)))
    assert y_train.shape == x.shape
    scaled = ref / (1.0 - drop_p)
    ok = jnp.isclose(y_train, scaled, atol=1e-5) | jnp.isclose(y_train, 0.0, atol=1e-6)
    assert bool(jnp.all(ok)), "dropout output contains unexpected values"

    print("KERNEL_OK")
</pallas_src>

<mosaic_0001>
module attributes {stable_mosaic.version = 11 : i64} {
  func.func @_pe_add_kernel(%arg0: i32, %arg1: memref<8x2x32xf32, #tpu.memory_space<vmem>>, %arg2: memref<8x1x32xf32, #tpu.memory_space<vmem>>, %arg3: memref<8x2x32xf32, #tpu.memory_space<vmem>>) attributes {dimension_semantics = [#tpu.dimension_semantics<parallel>], iteration_bounds = array<i64: 1>, scalar_prefetch = 0 : i64, scratch_operands = 0 : i64, tpu.core_type = #tpu.core_type<tc>, window_params = [{transform_indices = @transform_0, window_bounds = array<i64: 8, 2, 32>}, {transform_indices = @transform_1, window_bounds = array<i64: 8, 1, 32>}, {transform_indices = @transform_2, window_bounds = array<i64: 8, 2, 32>}]} {
    %c0 = arith.constant 0 : index
    %c0_0 = arith.constant 0 : index
    %c0_1 = arith.constant 0 : index
    %0 = vector.load %arg1[%c0, %c0_0, %c0_1] : memref<8x2x32xf32, #tpu.memory_space<vmem>>, vector<8x2x32xf32>
    %c0_2 = arith.constant 0 : index
    %c0_3 = arith.constant 0 : index
    %c0_4 = arith.constant 0 : index
    %1 = vector.load %arg2[%c0_2, %c0_3, %c0_4] : memref<8x1x32xf32, #tpu.memory_space<vmem>>, vector<8x1x32xf32>
    %2 = vector.broadcast %1 : vector<8x1x32xf32> to vector<8x2x32xf32>
    %3 = arith.addf %0, %2 : vector<8x2x32xf32>
    %c0_5 = arith.constant 0 : index
    %c0_6 = arith.constant 0 : index
    %c0_7 = arith.constant 0 : index
    %4 = vector.load %arg3[%c0_5, %c0_6, %c0_7] : memref<8x2x32xf32, #tpu.memory_space<vmem>>, vector<8x2x32xf32>
    tpu.vector_store %arg3[%c0_5, %c0_6, %c0_7], %3 {strides = array<i32>} : memref<8x2x32xf32, #tpu.memory_space<vmem>>, vector<8x2x32xf32>,
    return
  }
  func.func @transform_0(%arg0: i32) -> (i32, i32, i32) {
    %c0_i32 = arith.constant 0 : i32
    %c0_i32_0 = arith.constant 0 : i32
    %c0_i32_1 = arith.constant 0 : i32
    return %arg0, %c0_i32, %c0_i32_0 : i32, i32, i32
  }
  func.func @transform_1(%arg0: i32) -> (i32, i32, i32) {
    %c0_i32 = arith.constant 0 : i32
    %c0_i32_0 = arith.constant 0 : i32
    %c0_i32_1 = arith.constant 0 : i32
    return %arg0, %c0_i32, %c0_i32_0 : i32, i32, i32
  }
  func.func @transform_2(%arg0: i32) -> (i32, i32, i32) {
    %c0_i32 = arith.constant 0 : i32
    %c0_i32_0 = arith.constant 0 : i32
    %c0_i32_1 = arith.constant 0 : i32
    return %arg0, %c0_i32, %c0_i32_0 : i32, i32, i32
  }
}

</mosaic_0001>

<bundles_post_ra>
// kernel: tpu_custom_call.1
= control target key start
LH: loop header
LB: loop body
LE: loop exit
PB: predicated region body
PF: predicated region fallthrough
CT: control target
= control target key end

     0   :  { %7 = vsyncpa [#allocation3], 0  ;;  %s301_s0 = inlined_call_operand.hbm [shape: f32[8,2,32], index: 0, kind: input, shape index: {}]   ;;  %s302_s1 = inlined_call_operand.hbm [shape: f32[8,1,32], index: 1, kind: input, shape index: {}]   ;;  %s303_s2 = inlined_call_operand.hbm [shape: f32[8,2,32], index: 2, kind: output, shape index: {}]  }
   0x1   :  { %8 = vsyncpa [#allocation6], 0 }
   0x2   :  { %9 = vsyncpa [#allocation4], 0  ;;  %s226_s9 = smov [#allocation2]   ;;  %s154_s13 = scalar_lea.hbm %s301_s0, 256 }
   0x3   :  { %s15_s10 = sshll.u32 %s226_s9, 4  ;;  %p155_p0 = scmp.ne.s32.totalorder %s301_s0, %s154_s13  ;;  %s16_s10 = int_to_ptr.vmem [resolvable:$true] %s15_s10 }
   0x4   :  { %p158_p1 = scmp.lt.u32.totalorder %s154_s13, %s301_s0 }
   0x6   :  { %p160_p2 = pnand %p158_p1, %p155_p0 }
   0x8   :  { %163 = shalt.err (!%p160_p2)
}
   0x9   :  { %s164_s18 = scalar_lea.vmem %s16_s10, 256  ;;  %p169_p4 = scmp.lt.s32.totalorder %s16_s10, %s16_s10 }
   0xa   :  { %p165_p3 = scmp.ne.s32.totalorder %s16_s10, %s164_s18  ;;  %p170_p5 = scmp.lt.s32.totalorder %s164_s18, %s164_s18 }
   0xc   :  { %p171_p6 = por %p170_p5, %p169_p4 }
   0xe   :  { %p172_p7 = pnand %p171_p6, %p165_p3 }
  0x10   :  { %175 = shalt.err (!%p172_p7)
}
  0x11   :  { %s227_s19 = smov 32   ;;  %s228_s20 = smov 2  }
  0x12   :  { %21 = dma.hbm_to_vmem [thread:$0]  %s301_s0, 256, %s16_s10, [#allocation3], %s227_s19, %s227_s19, %s228_s20  }
  0x13   :  { %s229_s23 = smov [#allocation5]   ;;  %s176_s27 = scalar_lea.hbm %s302_s1, 128 }
  0x14   :  { %s27_s24 = sshll.u32 %s229_s23, 4  ;;  %p177_p8 = scmp.ne.s32.totalorder %s302_s1, %s176_s27  ;;  %s28_s24 = int_to_ptr.vmem [resolvable:$true] %s27_s24 }
  0x15   :  { %p180_p9 = scmp.lt.u32.totalorder %s176_s27, %s302_s1 }
  0x17   :  { %p182_p10 = pnand %p180_p9, %p177_p8 }
  0x19   :  { %185 = shalt.err (!%p182_p10)
}
  0x1a   :  { %s186_s4 = scalar_lea.vmem %s28_s24, 128  ;;  %p191_p12 = scmp.lt.s32.totalorder %s28_s24, %s28_s24 }
  0x1b   :  { %p187_p11 = scmp.ne.s32.totalorder %s28_s24, %s186_s4  ;;  %p192_p13 = scmp.lt.s32.totalorder %s186_s4, %s186_s4 }
  0x1d   :  { %p193_p0 = por %p192_p13, %p191_p12 }
  0x1f   :  { %p194_p1 = pnand %p193_p0, %p187_p11 }
  0x21   :  { %197 = shalt.err (!%p194_p1)
}
  0x22   :  { %s230_s0 = smov 16   ;;  %s231_s5 = smov 1  }
  0x23   :  { %33 = dma.hbm_to_vmem [thread:$0]  %s302_s1, 128, %s28_s24, [#allocation6], %s230_s0, %s230_s0, %s231_s5  }
  0x24   :  { %220 = dma.done.wait [#allocation3], 256  }
  0x25   :  { %221 = vsyncadd [#allocation3], 4294967040 }
  0x26   :  { %222 = dma.done.wait [#allocation6], 128  }
  0x27   :  { %223 = vsyncadd [#allocation6], 4294967168  ;;  %vm112_vm0 = vcmask 254976   ;;  %s232_s8 = smov [#allocation7]   ;;  %v40_v0 = vld [vmem:[#allocation2] sm:$0x3] }
  0x28   :  { %s275_s9 = sshll.u32 %s232_s8, 4  ;;  %v139_v1 = vld [vmem:[#allocation5] ss:$0 sm:$0xff]  ;;  %v41_v2 = vld [vmem:[#allocation2 + $0x2] sm:$0x3]  ;;  %s127_s9 = int_to_ptr.vmem [resolvable:$true] %s275_s9 }
  0x29   :  { %v104_v3 = vadd.f32 %v139_v1, %v40_v0  ;;  %v140_v4 = vld [vmem:[#allocation5 + $0x1] ss:$0 sm:$0xff]  ;;  %v42_v5 = vld [vmem:[#allocation2 + $0x4] sm:$0x3]  ;;  %v141_v6 = vld [vmem:[#allocation5 + $0x2] ss:$0 sm:$0xff]  ;;  %p203_p3 = scmp.lt.s32.totalorder %s127_s9, %s127_s9 }
  0x2a   :  { %v105_v7 = vadd.f32 %v140_v4, %v41_v2  ;;  %v106_v8 = vadd.f32 %v141_v6, %v42_v5  ;;  %v43_v9 = vld [vmem:[#allocation2 + $0x6] sm:$0x3]  ;;  %v142_v10 = vld [vmem:[#allocation5 + $0x3] ss:$0 sm:$0xff]  ;;  %v44_v11 = vld [vmem:[#allocation2 + $0x8] sm:$0x3] }
  0x2b   :  { %113 = vst.msk [vmem:[#allocation7] sm:$0x3] %vm112_vm0, %v104_v3  ;;  %v107_v12 = vadd.f32 %v142_v10, %v43_v9  ;;  %v143_v13 = vld [vmem:[#allocation5 + $0x4] ss:$0 sm:$0xff]  ;;  %v45_v14 = vld [vmem:[#allocation2 + $0xa] sm:$0x3] }
  0x2c   :  { %v144_v15 = vld [vmem:[#allocation5 + $0x5] ss:$0 sm:$0xff]  ;;  %114 = vst.msk [vmem:[#allocation7 + $0x2] sm:$0x3] %vm112_vm0, %v105_v7  ;;  %115 = vst.msk [vmem:[#allocation7 + $0x4] sm:$0x3] %vm112_vm0, %v106_v8  ;;  %v108_v16 = vadd.f32 %v143_v13, %v44_v11 }
  0x2d   :  { %v109_v17 = vadd.f32 %v144_v15, %v45_v14  ;;  %v46_v18 = vld [vmem:[#allocation2 + $0xc] sm:$0x3]  ;;  %v145_v19 = vld [vmem:[#allocation5 + $0x6] ss:$0 sm:$0xff]  ;;  %v47_v20 = vld [vmem:[#allocation2 + $0xe] sm:$0x3] }
  0x2e   :  { %116 = vst.msk [vmem:[#allocation7 + $0x6] sm:$0x3] %vm112_vm0, %v107_v12  ;;  %v110_v21 = vadd.f32 %v145_v19, %v46_v18  ;;  %v146_v22 = vld [vmem:[#allocation5 + $0x7] ss:$0 sm:$0xff]  ;;  %117 = vst.msk [vmem:[#allocation7 + $0x8] sm:$0x3] %vm112_vm0, %v108_v16 }
  0x2f   :  { %118 = vst.msk [vmem:[#allocation7 + $0xa] sm:$0x3] %vm112_vm0, %v109_v17  ;;  %v111_v23 = vadd.f32 %v146_v22, %v47_v20  ;;  %s198_s1 = scalar_lea.vmem %s127_s9, 256 }
  0x30   :  { %119 = vst.msk [vmem:[#allocation7 + $0xc] sm:$0x3] %vm112_vm0, %v110_v21  ;;  %p199_p2 = scmp.ne.s32.totalorder %s127_s9, %s198_s1  ;;  %p204_p4 = scmp.lt.s32.totalorder %s198_s1, %s198_s1 }
  0x31   :  { %120 = vst.msk [vmem:[#allocation7 + $0xe] sm:$0x3] %vm112_vm0, %v111_v23 }
  0x32   :  { %p205_p5 = por %p204_p4, %p203_p3 }
  0x34   :  { %p206_p6 = pnand %p205_p5, %p199_p2 }
  0x36   :  { %209 = shalt.err (!%p206_p6)
}
  0x37   :  { %s210_s12 = scalar_lea.hbm %s303_s2, 256 }
  0x38   :  { %p211_p7 = scmp.ne.s32.totalorder %s303_s2, %s210_s12  ;;  %p214_p8 = scmp.lt.u32.totalorder %s210_s12, %s303_s2 }
  0x3a   :  { %p216_p9 = pnand %p214_p8, %p211_p7 }
  0x3c   :  { %219 = shalt.err (!%p216_p9)
}
  0x3d   :  { %132 = dma.vmem_to_hbm [thread:$0]  %s127_s9, 256, %s303_s2, [#allocation4], %s227_s19, %s227_s19, %s228_s20  }
  0x3e   :  { %224 = dma.done.wait [#allocation4], 256  }
  0x3f   :  { %225 = vsyncadd [#allocation4], 4294967040 }
  0x40   :  { %136 = vsyncpa [#allocation3], 1 }
  0x41   :  { %137 = vsyncpa [#allocation6], 1 }
  0x42   :  { %138 = vsyncpa [#allocation4], 1 }

</bundles_post_ra>
